<compile_context>
chip_gen: v6e
topology: v6e:2x2x1
jax: 0.10.0
libtpu: 0.0.40
codegen_flags: <defaults>
</compile_context>

<pallas_src>
import math

import jax
import jax.numpy as jnp
from jax.experimental import pallas as pl
from jax.experimental.pallas import tpu as pltpu


def time_embedding_kernel(x_ref, w1_ref, b1_ref, w2_ref, b2_ref, o_ref):
    # linear_1: (B, n) @ (n, 4n) -> f32 accumulate + f32 bias.
    h = jnp.dot(x_ref[...], w1_ref[...], preferred_element_type=jnp.float32) + b1_ref[...]
    # TODO(synk): no activation on purpose — the reference `nn.SiLU(x)` constructs
    # the module and never applies it, so forward == linear_2(linear_1(x)).
    h = h.astype(w2_ref.dtype)
    # linear_2 over this grid step's output-column slice.
    y = jnp.dot(h, w2_ref[...], preferred_element_type=jnp.float32) + b2_ref[...]
    o_ref[...] = y.astype(o_ref.dtype)


def prepare_time_embedding_params(w1, b1, w2, b2, param_dtype=jnp.bfloat16):
    """One-time conversion of torch-layout params to kernel layout.

    w1: (4n, n), b1: (4n,), w2: (4n, 4n), b2: (4n,)  ->
    weights transposed to (in, out) layout in `param_dtype` (bf16 by default),
    biases reshaped to (1, out) and kept float32.  Do this once at load time.
    """
    w1_t = jnp.asarray(w1).T.astype(param_dtype)
    w2_t = jnp.asarray(w2).T.astype(param_dtype)
    b1_r = jnp.asarray(b1, jnp.float32).reshape(1, -1)
    b2_r = jnp.asarray(b2, jnp.float32).reshape(1, -1)
    return w1_t, b1_r, w2_t, b2_r


def _nbytes(shape, dtype):
    return math.prod(shape) * jnp.dtype(dtype).itemsize


def _num_tensorcores():
    """Best-effort TensorCore count. Defaults to 1 (safe, simpler config)."""
    try:
        info = pltpu.get_tpu_info()
    except Exception:
        return 1
    for attr in ("num_cores", "num_tensorcores", "num_tensor_cores",
                 "tensorcore_count", "core_count"):
        v = getattr(info, attr, None)
        if isinstance(v, int) and v > 0:
            return v
    return 1


def time_embedding(x, w1_t, b1_r, w2_t, b2_r, *, n_blocks=None):
    """x: (B, n_embed) f32; params from `prepare_time_embedding_params`."""
    B, n = x.shape
    n4 = w1_t.shape[1]

    # Pad batch rows to a multiple of 8 (sublane-aligned, unmasked output vst)
    # and cast x to the weight dtype once here (outside the kernel).
    B_pad = max(8, pl.cdiv(B, 8) * 8)
    xp = x.astype(w1_t.dtype)
    if B_pad != B:
        xp = jnp.pad(xp, ((0, B_pad - B), (0, 0)))

    # Output-column split: only worth it when the "parallel" grid axis is truly
    # sharded across >1 TensorCores (v7x).  On single-TC chips (v5e/v6e) the
    # grid is a sequential loop and a second step just duplicates the first
    # GEMM plus fixed per-step overhead, so force a single block there.
    if n_blocks is None:
        n_blocks = 2 if (_num_tensorcores() >= 2 and n4 % 256 == 0) else 1
    if n_blocks < 1 or n4 % (128 * n_blocks) != 0:
        n_blocks = 1
    bn = n4 // n_blocks

    grid_spec = pltpu.PrefetchScalarGridSpec(
        num_scalar_prefetch=0,
        grid=(n_blocks,),
        in_specs=[
            pl.BlockSpec((B_pad, n), lambda j: (0, 0)),    # x     (grid-invariant)
            pl.BlockSpec((n, n4), lambda j: (0, 0)),       # w1^T  (grid-invariant)
            pl.BlockSpec((1, n4), lambda j: (0, 0)),       # b1    (grid-invariant)
            pl.BlockSpec((n4, bn), lambda j: (0, j)),      # w2^T  (column slice)
            pl.BlockSpec((1, bn), lambda j: (0, j)),       # b2    (column slice)
        ],
        out_specs=pl.BlockSpec((B_pad, bn), lambda j: (0, j)),
    )

    # Advisory cost estimate: two chained GEMMs, traffic dominated by weights.
    flops = 2 * B_pad * n * n4 * n_blocks + 2 * B_pad * n4 * n4
    bytes_accessed = (
        _nbytes((B_pad, n), xp.dtype)
        + _nbytes(w1_t.shape, w1_t.dtype)
        + _nbytes(b1_r.shape, b1_r.dtype)
        + _nbytes(w2_t.shape, w2_t.dtype)
        + _nbytes(b2_r.shape, b2_r.dtype)
        + _nbytes((B_pad, n4), jnp.float32)
    )
    cost = pl.CostEstimate(flops=flops, transcendentals=0, bytes_accessed=bytes_accessed)

    # Explicit VMEM budget: double-buffered blocks + 1 MiB headroom, clamped to
    # 48 MiB so headroom is always kept under v7x's 64 MiB physical VMEM.
    blk_bytes = (
        _nbytes((B_pad, n), xp.dtype)
        + _nbytes((n, n4), w1_t.dtype)
        + _nbytes((1, n4), b1_r.dtype)
        + _nbytes((n4, bn), w2_t.dtype)
        + _nbytes((1, bn), b2_r.dtype)
        + _nbytes((B_pad, bn), jnp.float32)
    )
    vmem_limit = min(48 * 1024 * 1024, max(4 * 1024 * 1024, 2 * blk_bytes + (1 << 20)))

    out = pl.pallas_call(
        time_embedding_kernel,
        out_shape=jax.ShapeDtypeStruct((B_pad, n4), jnp.float32),
        grid_spec=grid_spec,
        compiler_params=pltpu.CompilerParams(
            dimension_semantics=("parallel",),
            vmem_limit_bytes=vmem_limit,
        ),
        cost_estimate=cost,
    )(xp, w1_t, b1_r, w2_t, b2_r)

    return out[:B] if B_pad != B else out


def _ref_f32(x, w1, b1, w2, b2):
    # Independent full-f32 baseline, torch layout: linear_2(linear_1(x)), no SiLU.
    h = x @ w1.T + b1
    return h @ w2.T + b2


def _run_case(n_embed, batch, seed, force_blocks=None):
    n4 = 4 * n_embed
    key = jax.random.PRNGKey(seed)
    kx, kw1, kb1, kw2, kb2 = jax.random.split(key, 5)

    # Deterministic synthetic params (PyTorch-Linear-style uniform init), torch layout.
    bound1 = 1.0 / math.sqrt(n_embed)
    bound2 = 1.0 / math.sqrt(n4)
    x = jax.random.normal(kx, (batch, n_embed), dtype=jnp.float32)
    w1 = jax.random.uniform(kw1, (n4, n_embed), jnp.float32, -bound1, bound1)
    b1 = jax.random.uniform(kb1, (n4,), jnp.float32, -bound1, bound1)
    w2 = jax.random.uniform(kw2, (n4, n4), jnp.float32, -bound2, bound2)
    b2 = jax.random.uniform(kb2, (n4,), jnp.float32, -bound2, bound2)

    # One-time param prep (transpose + bf16 cast) — not on the per-call path.
    params = prepare_time_embedding_params(w1, b1, w2, b2)

    out = time_embedding(x, *params, n_blocks=force_blocks)
    out = jax.block_until_ready(out)

    ref = _ref_f32(x, w1, b1, w2, b2)
    assert out.shape == (batch, n4)
    # bf16 weight / bf16 intermediate path vs full-f32 reference -> loose tolerance.
    assert jnp.allclose(out, ref, atol=3e-2, rtol=3e-2), (
        f"mismatch vs f32 reference at n_embed={n_embed}, n_blocks={force_blocks}"
    )


if __name__ == "__main__":
    # n_embed=64 -> n4=256: auto block count (2-way split only on multi-TC chips).
    _run_case(n_embed=64, batch=2, seed=0)
    # Same size with the 2-way column split forced, to exercise that code path
    # for correctness on any chip.
    _run_case(n_embed=64, batch=2, seed=0, force_blocks=2)
    # n_embed=32 -> n4=128: single-block path.
    _run_case(n_embed=32, batch=2, seed=1)
    print("KERNEL_OK")
</pallas_src>

<mosaic_0001>
module attributes {stable_mosaic.version = 11 : i64} {
  func.func @time_embedding_kernel(%arg0: i32, %arg1: memref<8x64xbf16, #tpu.memory_space<vmem>>, %arg2: memref<64x256xbf16, #tpu.memory_space<vmem>>, %arg3: memref<1x256xf32, #tpu.memory_space<vmem>>, %arg4: memref<256x256xbf16, #tpu.memory_space<vmem>>, %arg5: memref<1x256xf32, #tpu.memory_space<vmem>>, %arg6: memref<8x256xf32, #tpu.memory_space<vmem>>) attributes {dimension_semantics = [#tpu.dimension_semantics<parallel>], iteration_bounds = array<i64: 1>, scalar_prefetch = 0 : i64, scratch_operands = 0 : i64, tpu.core_type = #tpu.core_type<tc>, window_params = [{pipeline_mode = #tpu.pipeline_mode<synchronous>, transform_indices = @transform_0, window_bounds = array<i64: 8, 64>}, {pipeline_mode = #tpu.pipeline_mode<synchronous>, transform_indices = @transform_1, window_bounds = array<i64: 64, 256>}, {pipeline_mode = #tpu.pipeline_mode<synchronous>, transform_indices = @transform_2, window_bounds = array<i64: 1, 256>}, {transform_indices = @transform_3, window_bounds = array<i64: 256, 256>}, {transform_indices = @transform_4, window_bounds = array<i64: 1, 256>}, {transform_indices = @transform_5, window_bounds = array<i64: 8, 256>}]} {
    %c0 = arith.constant 0 : index
    %c0_0 = arith.constant 0 : index
    %0 = vector.load %arg1[%c0, %c0_0] : memref<8x64xbf16, #tpu.memory_space<vmem>>, vector<8x64xbf16>
    %c0_1 = arith.constant 0 : index
    %c0_2 = arith.constant 0 : index
    %1 = vector.load %arg2[%c0_1, %c0_2] : memref<64x256xbf16, #tpu.memory_space<vmem>>, vector<64x256xbf16>
    %cst = arith.constant dense<0.000000e+00> : vector<8x256xf32>
    %2 = tpu.matmul %0, %1, %cst {dimension_numbers = #tpu.dot_dimension_numbers<[1], [0], [0], [1], [0, 0, 1, 1], [], []>} : vector<8x64xbf16>, vector<64x256xbf16>, vector<8x256xf32> -> vector<8x256xf32>
    %c0_3 = arith.constant 0 : index
    %c0_4 = arith.constant 0 : index
    %3 = vector.load %arg3[%c0_3, %c0_4] : memref<1x256xf32, #tpu.memory_space<vmem>>, vector<1x256xf32>
    %4 = vector.broadcast %3 : vector<1x256xf32> to vector<8x256xf32>
    %5 = arith.addf %2, %4 : vector<8x256xf32>
    %6 = arith.truncf %5 : vector<8x256xf32> to vector<8x256xbf16>
    %c0_5 = arith.constant 0 : index
    %c0_6 = arith.constant 0 : index
    %7 = vector.load %arg4[%c0_5, %c0_6] : memref<256x256xbf16, #tpu.memory_space<vmem>>, vector<256x256xbf16>
    %cst_7 = arith.constant dense<0.000000e+00> : vector<8x256xf32>
    %8 = tpu.matmul %6, %7, %cst_7 {dimension_numbers = #tpu.dot_dimension_numbers<[1], [0], [0], [1], [0, 0, 1, 1], [], []>} : vector<8x256xbf16>, vector<256x256xbf16>, vector<8x256xf32> -> vector<8x256xf32>
    %c0_8 = arith.constant 0 : index
    %c0_9 = arith.constant 0 : index
    %9 = vector.load %arg5[%c0_8, %c0_9] : memref<1x256xf32, #tpu.memory_space<vmem>>, vector<1x256xf32>
    %10 = vector.broadcast %9 : vector<1x256xf32> to vector<8x256xf32>
    %11 = arith.addf %8, %10 : vector<8x256xf32>
    %c0_10 = arith.constant 0 : index
    %c0_11 = arith.constant 0 : index
    %12 = vector.load %arg6[%c0_10, %c0_11] : memref<8x256xf32, #tpu.memory_space<vmem>>, vector<8x256xf32>
    tpu.vector_store %arg6[%c0_10, %c0_11], %11 {strides = array<i32>} : memref<8x256xf32, #tpu.memory_space<vmem>>, vector<8x256xf32>,
    return
  }
  func.func @transform_0(%arg0: i32) -> (i32, i32) {
    %c0_i32 = arith.constant 0 : i32
    %c0_i32_0 = arith.constant 0 : i32
    %c0_i32_1 = arith.constant 0 : i32
    return %c0_i32, %c0_i32_0 : i32, i32
  }
  func.func @transform_1(%arg0: i32) -> (i32, i32) {
    %c0_i32 = arith.constant 0 : i32
    %c0_i32_0 = arith.constant 0 : i32
    %c0_i32_1 = arith.constant 0 : i32
    return %c0_i32, %c0_i32_0 : i32, i32
  }
  func.func @transform_2(%arg0: i32) -> (i32, i32) {
    %c0_i32 = arith.constant 0 : i32
    %c0_i32_0 = arith.constant 0 : i32
    %c0_i32_1 = arith.constant 0 : i32
    return %c0_i32, %c0_i32_0 : i32, i32
  }
  func.func @transform_3(%arg0: i32) -> (i32, i32) {
    %c0_i32 = arith.constant 0 : i32
    %c0_i32_0 = arith.constant 0 : i32
    return %c0_i32, %arg0 : i32, i32
  }
  func.func @transform_4(%arg0: i32) -> (i32, i32) {
    %c0_i32 = arith.constant 0 : i32
    %c0_i32_0 = arith.constant 0 : i32
    return %c0_i32, %arg0 : i32, i32
  }
  func.func @transform_5(%arg0: i32) -> (i32, i32) {
    %c0_i32 = arith.constant 0 : i32
    %c0_i32_0 = arith.constant 0 : i32
    return %c0_i32, %arg0 : i32, i32
  }
}

</mosaic_0001>

<bundles_post_ra>
// kernel: tpu_custom_call.1
= control target key start
LH: loop header
LB: loop body
LE: loop exit
PB: predicated region body
PF: predicated region fallthrough
CT: control target
= control target key end

     0   :  { %10 = vsyncpa [#allocation3], 0  ;;  %s681_s0 = inlined_call_operand.hbm [shape: bf16[8,64], index: 0, kind: input, shape index: {}]   ;;  %s682_s1 = inlined_call_operand.hbm [shape: bf16[64,256], index: 1, kind: input, shape index: {}]   ;;  %s683_s2 = inlined_call_operand.vmem [shape: f32[1,256], index: 2, kind: input, shape index: {}]   ;;  %s684_s3 = inlined_call_operand.hbm [shape: bf16[256,256], index: 3, kind: input, shape index: {}]   ;;  %s685_s4 = inlined_call_operand.vmem [shape: f32[1,256], index: 4, kind: input, shape index: {}]   ;;  %s686_s5 = inlined_call_operand.hbm [shape: f32[8,256], index: 5, kind: output, shape index: {}]  }
   0x1   :  { %11 = vsyncpa [#allocation6], 0 }
   0x2   :  { %12 = vsyncpa [#allocation4], 0  ;;  %s626_s18 = smov [#allocation5]  }
   0x3   :  { %s28_s19 = sshll.u32 %s626_s18, 4  ;;  %s29_s19 = int_to_ptr.vmem [resolvable:$true] %s28_s19 }
   0x4   :  { %s548_s20 = scalar_lea.vmem %s29_s19, 1024  ;;  %p553_p1 = scmp.lt.s32.totalorder %s29_s19, %s29_s19 }
   0x5   :  { %p549_p0 = scmp.ne.s32.totalorder %s29_s19, %s548_s20  ;;  %p554_p2 = scmp.lt.s32.totalorder %s548_s20, %s548_s20 }
   0x7   :  { %p555_p3 = por %p554_p2, %p553_p1 }
   0x9   :  { %p556_p4 = pnand %p555_p3, %p549_p0 }
   0xb   :  { %559 = shalt.err (!%p556_p4)
}
   0xc   :  { %s627_s21 = smov 128   ;;  %s628_s22 = smov 8  }
   0xd   :  { %34 = dma.hbm_to_vmem [thread:$0]  %s682_s1, 1024, %s29_s19, [#allocation6], %s627_s21, %s627_s21, %s628_s22  }
   0xe   :  { %s629_s25 = smov [#allocation2]   ;;  %s630_s27 = smov [#allocation7]  }
   0xf   :  { %s19_s26 = sshll.u32 %s629_s25, 4  ;;  %s42_s28 = sshll.u32 %s630_s27, 4  ;;  %s20_s26 = int_to_ptr.vmem [resolvable:$true] %s19_s26  ;;  %s43_s28 = int_to_ptr.vmem [resolvable:$true] %s42_s28 }
  0x10   :  { %s568_s29 = scalar_lea.vmem %s20_s26, 64  ;;  %p573_p6 = scmp.lt.s32.totalorder %s20_s26, %s20_s26 }
  0x11   :  { %p569_p5 = scmp.ne.s32.totalorder %s20_s26, %s568_s29  ;;  %p574_p7 = scmp.lt.s32.totalorder %s568_s29, %s568_s29 }
  0x13   :  { %p575_p8 = por %p574_p7, %p573_p6 }
  0x15   :  { %p576_p9 = pnand %p575_p8, %p569_p5 }
  0x17   :  { %579 = shalt.err (!%p576_p9)
}
  0x18   :  { %22 = dma.hbm_to_vmem [thread:$0]  %s681_s0, 64, %s20_s26, [#allocation3]  }
  0x19   :  { %s588_s7 = scalar_lea.vmem %s43_s28, 4096  ;;  %p593_p11 = scmp.lt.s32.totalorder %s43_s28, %s43_s28 }
  0x1a   :  { %p589_p10 = scmp.ne.s32.totalorder %s43_s28, %s588_s7  ;;  %p594_p12 = scmp.lt.s32.totalorder %s588_s7, %s588_s7 }
  0x1c   :  { %p595_p13 = por %p594_p12, %p593_p11 }
  0x1e   :  { %p596_p0 = pnand %p595_p13, %p589_p10 }
  0x20   :  { %599 = shalt.err (!%p596_p0)
}
  0x21   :  { %48 = dma.hbm_to_vmem [thread:$0]  %s684_s3, 4096, %s43_s28, [#allocation6], %s627_s21, %s627_s21, %s628_s22  }
  0x22   :  { %620 = dma.done.wait [#allocation3], 64  }
  0x23   :  { %621 = vsyncadd [#allocation3], 4294967232 }
  0x24   :  { %622 = dma.done.wait [#allocation6], 5120  }
  0x25   :  { %623 = vsyncadd [#allocation6], 4294962176  ;;  %v631_v0 = vmov 0   ;;  %v480_v1 = vld [vmem:[#allocation5 + $0x34] ss:$8 sps:$4 sm:$0xff]   ;;  %vm122_vm0 = vcmask 523264   ;;  %v72_v42 = vlaneseq }
  0x26   :  { %158 = vmatprep.mubr.bf16.mxu0 %v631_v0  ;;  %v482_v2 = vld [vmem:[#allocation5 + $0x30] ss:$8 sps:$4 sm:$0xff]   ;;  %134 = vmatprep.subr.bf16.mxu0 %v480_v1  ;;  %v483_v3 = vld [vmem:[#allocation5 + $0x24] ss:$8 sps:$4 sm:$0xff]   ;;  %v485_v4 = vld [vmem:[#allocation5 + $0x20] ss:$8 sps:$4 sm:$0xff]  }
  0x27   :  { %135 = vmatpush1.bf16.msra.mxu0 %v482_v2  ;;  %v486_v5 = vld [vmem:[#allocation5 + $0x14] ss:$8 sps:$4 sm:$0xff]   ;;  %v488_v6 = vld [vmem:[#allocation5 + $0x10] ss:$8 sps:$4 sm:$0xff]   ;;  %v495_v9 = vld [vmem:[#allocation7 + $0x64] ss:$8 sps:$4 sm:$0xff]  }
  0x28   :  { %136 = vmatprep.subr.bf16.mxu0 %v483_v3  ;;  %v492_v7 = vld [vmem:[#allocation7 + $0x74] ss:$8 sps:$4 sm:$0xff]   ;;  %v494_v8 = vld [vmem:[#allocation7 + $0x70] ss:$8 sps:$4 sm:$0xff]   ;;  %v489_v10 = vld [vmem:[#allocation5 + $0x4] ss:$8 sps:$4 sm:$0xff]  }
  0x29   :  { %373 = vmatprep.subr.bf16.mxu1 %v492_v7  ;;  %v497_v11 = vld [vmem:[#allocation7 + $0x60] ss:$8 sps:$4 sm:$0xff]   ;;  %v498_v12 = vld [vmem:[#allocation7 + $0x54] ss:$8 sps:$4 sm:$0xff]   ;;  %v500_v14 = vld [vmem:[#allocation7 + $0x50] ss:$8 sps:$4 sm:$0xff]  }
  0x2a   :  { %374 = vmatpush1.bf16.msra.mxu1 %v494_v8  ;;  %v491_v13 = vld [vmem:[#allocation5] ss:$8 sps:$4 sm:$0xff]   ;;  %v501_v15 = vld [vmem:[#allocation7 + $0x44] ss:$8 sps:$4 sm:$0xff]   ;;  %v61_v16 = vld [vmem:[#allocation2] sm:$0xf] }
  0x2b   :  { %137 = vmatpush1.bf16.msra.mxu0 %v485_v4  ;;  %375 = vmatprep.subr.bf16.mxu1 %v495_v9  ;;  %v503_v17 = vld [vmem:[#allocation7 + $0x40] ss:$8 sps:$4 sm:$0xff]   ;;  %v504_v18 = vld [vmem:[#allocation7 + $0x34] ss:$8 sps:$4 sm:$0xff]   ;;  %v506_v19 = vld [vmem:[#allocation7 + $0x30] ss:$8 sps:$4 sm:$0xff]  }
  0x2c   :  { %138 = vmatprep.subr.bf16.mxu0 %v486_v5  ;;  %v507_v20 = vld [vmem:[#allocation7 + $0x24] ss:$8 sps:$4 sm:$0xff]   ;;  %v509_v21 = vld [vmem:[#allocation7 + $0x20] ss:$8 sps:$4 sm:$0xff]   ;;  %v510_v22 = vld [vmem:[#allocation7 + $0x14] ss:$8 sps:$4 sm:$0xff]  }
  0x2d   :  { %v512_v23 = vld [vmem:[#allocation7 + $0x10] ss:$8 sps:$4 sm:$0xff]   ;;  %v513_v24 = vld [vmem:[#allocation7 + $0x4] ss:$8 sps:$4 sm:$0xff]   ;;  %v515_v25 = vld [vmem:[#allocation7] ss:$8 sps:$4 sm:$0xff]  }
  0x2e   :  { %376 = vmatpush1.bf16.msra.mxu1 %v497_v11  ;;  %v516_v26 = vld [vmem:[#allocation7 + $0xf4] ss:$8 sps:$4 sm:$0xff]   ;;  %v518_v27 = vld [vmem:[#allocation7 + $0xf0] ss:$8 sps:$4 sm:$0xff]   ;;  %v519_v28 = vld [vmem:[#allocation7 + $0xe4] ss:$8 sps:$4 sm:$0xff]  }
  0x2f   :  { %139 = vmatpush1.bf16.msra.mxu0 %v488_v6  ;;  %377 = vmatprep.subr.bf16.mxu1 %v498_v12  ;;  %v521_v29 = vld [vmem:[#allocation7 + $0xe0] ss:$8 sps:$4 sm:$0xff]   ;;  %v522_v30 = vld [vmem:[#allocation7 + $0xd4] ss:$8 sps:$4 sm:$0xff]   ;;  %v524_v31 = vld [vmem:[#allocation7 + $0xd0] ss:$8 sps:$4 sm:$0xff]  }
  0x30   :  { %140 = vmatprep.subr.bf16.mxu0 %v489_v10  ;;  %v525_v32 = vld [vmem:[#allocation7 + $0xc4] ss:$8 sps:$4 sm:$0xff]   ;;  %v527_v33 = vld [vmem:[#allocation7 + $0xc0] ss:$8 sps:$4 sm:$0xff]   ;;  %v528_v34 = vld [vmem:[#allocation7 + $0xb4] ss:$8 sps:$4 sm:$0xff]  }
  0x31   :  { %v530_v35 = vld [vmem:[#allocation7 + $0xb0] ss:$8 sps:$4 sm:$0xff]   ;;  %v531_v36 = vld [vmem:[#allocation7 + $0xa4] ss:$8 sps:$4 sm:$0xff]   ;;  %v533_v37 = vld [vmem:[#allocation7 + $0xa0] ss:$8 sps:$4 sm:$0xff]  }
  0x32   :  { %378 = vmatpush1.bf16.msra.mxu1 %v500_v14  ;;  %v534_v38 = vld [vmem:[#allocation7 + $0x94] ss:$8 sps:$4 sm:$0xff]   ;;  %v536_v39 = vld [vmem:[#allocation7 + $0x90] ss:$8 sps:$4 sm:$0xff]   ;;  %v537_v40 = vld [vmem:[#allocation7 + $0x84] ss:$8 sps:$4 sm:$0xff]  }
  0x33   :  { %141 = vmatpush1.bf16.msra.mxu0 %v491_v13  ;;  %379 = vmatprep.subr.bf16.mxu1 %v501_v15  ;;  %v539_v41 = vld [vmem:[#allocation7 + $0x80] ss:$8 sps:$4 sm:$0xff]   ;;  %v73_v43 = vshrl.u32 %v72_v42, 7  ;;  %v70_v45 = vld [vmem:[%s683_s2] sm:$0x3]  ;;  %s632_s2 = smov [#allocation8]  }
  0x34   :  { %v201_v57 = vld [vmem:[%s685_s4] sm:$0x3]  ;;  %s422_s11 = sshll.u32 %s632_s2, 4  ;;  %s423_s11 = int_to_ptr.vmem [resolvable:$true] %s422_s11 }
  0x35   :  { %v74_v44 = vsub.s32 0, %v73_v43  ;;  %v78_v46 = vsub.s32 1, %v73_v43  ;;  %s600_s12 = scalar_lea.vmem %s423_s11, 256  ;;  %p605_p2 = scmp.lt.s32.totalorder %s423_s11, %s423_s11 }
  0x36   :  { %440 = vmatmul.mubr.msk.bf16.vlgmr.msra.gmra.mxu0 %vm122_vm0, %v61_v16  ;;  %380 = vmatpush1.bf16.msra.mxu1 %v503_v17  ;;  %p601_p1 = scmp.ne.s32.totalorder %s423_s11, %s600_s12  ;;  %p606_p3 = scmp.lt.s32.totalorder %s600_s12, %s600_s12 }
  0x37   :  { %381 = vmatprep.subr.bf16.mxu1 %v504_v18  ;;  %v75_v47 = vrot.slane %v70_v45, %v74_v44  ;;  %v79_v48 = vrot.slane %v70_v45, %v78_v46  ;;  %v206_v58 = vrot.slane %v201_v57, %v74_v44  ;;  %v210_v59 = vrot.slane %v201_v57, %v78_v46 }
  0x38   :  { %p607_p4 = por %p606_p3, %p605_p2 }
  0x3a   :  { %382 = vmatpush1.bf16.msra.mxu1 %v506_v19  ;;  %p608_p5 = pnand %p607_p4, %p601_p1 }
  0x3b   :  { %383 = vmatprep.subr.bf16.mxu1 %v507_v20 }
  0x3e   :  { %384 = vmatpush1.bf16.msra.mxu1 %v509_v21 }
  0x3f   :  { %385 = vmatprep.subr.bf16.mxu1 %v510_v22 }
  0x42   :  { %386 = vmatpush1.bf16.msra.mxu1 %v512_v23 }
  0x43   :  { %387 = vmatprep.subr.bf16.mxu1 %v513_v24 }
  0x46   :  { %388 = vmatpush1.bf16.msra.mxu1 %v515_v25 }
  0x47   :  { %389 = vmatprep.subr.bf16.mxu1 %v516_v26 }
  0x4a   :  { %390 = vmatpush2.bf16.msra.mxu1 %v518_v27 }
  0x4b   :  { %391 = vmatprep.subr.bf16.mxu1 %v519_v28 }
  0x4e   :  { %392 = vmatpush2.bf16.msra.mxu1 %v521_v29 }
  0x4f   :  { %393 = vmatprep.subr.bf16.mxu1 %v522_v30 }
  0x52   :  { %394 = vmatpush2.bf16.msra.mxu1 %v524_v31 }
  0x53   :  { %395 = vmatprep.subr.bf16.mxu1 %v525_v32 }
  0x56   :  { %396 = vmatpush2.bf16.msra.mxu1 %v527_v33 }
  0x57   :  { %397 = vmatprep.subr.bf16.mxu1 %v528_v34 }
  0x5a   :  { %398 = vmatpush2.bf16.msra.mxu1 %v530_v35 }
  0x5b   :  { %399 = vmatprep.subr.bf16.mxu1 %v531_v36 }
  0x5e   :  { %400 = vmatpush2.bf16.msra.mxu1 %v533_v37 }
  0x5f   :  { %401 = vmatprep.subr.bf16.mxu1 %v534_v38 }
  0x62   :  { %402 = vmatpush2.bf16.msra.mxu1 %v536_v39 }
  0x63   :  { %403 = vmatprep.subr.bf16.mxu1 %v537_v40 }
  0x66   :  { %404 = vmatpush2.bf16.msra.mxu1 %v539_v41 }
  0xf6   :  { %v160_v49 = vpop.f32.mrf.mxu0 }
  0xf7   :  { %v161_v50 = vadd.f32 %v160_v49, %v75_v47 }
  0xf8   :  { %v162_v51 = vpop.f32.mrf.mxu0 }
  0xf9   :  { %v163_v52 = vadd.f32 %v162_v51, %v79_v48  ;;  %v167_v55 = vpack.c.bf16 %v161_v50, %v161_v50 }
  0xfa   :  { %v164_v53 = vpop.f32.mrf.mxu0 }
  0xfb   :  { %v168_v54 = vpack.c.bf16 %v163_v52, %v163_v52 }
  0xfc   :  { %v165_v56 = vpop.f32.mrf.mxu0 }
  0xfd   :  { %405 = vmatprep.mubr.bf16.mxu1 %v168_v54 }
  0xfe   :  { %406 = vmatmul.mubr.bf16.vlgmr.msra.gmra.mxu1 %v167_v55 }
 0x1be   :  { %v407_v60 = vpop.f32.mrf.mxu1 }
 0x1bf   :  { %v408_v61 = vadd.f32 %v407_v60, %v206_v58 }
 0x1c0   :  { %v409_v62 = vpop.f32.mrf.mxu1 }
 0x1c1   :  { %414 = vst [vmem:[#allocation8] sm:$0xff] %v408_v61  ;;  %v410_v63 = vadd.f32 %v409_v62, %v210_v59 }
 0x1c2   :  { %v411_v0 = vpop.f32.mrf.mxu1 }
 0x1c3   :  { %415 = vst [vmem:[#allocation8 + $0x8] sm:$0xff] %v410_v63 }
 0x1c4   :  { %v412_v1 = vpop.f32.mrf.mxu1 }
 0x1c5   :  { %611 = shalt.err (!%p608_p5)
}
 0x1c6   :  { %425 = dma.vmem_to_hbm [thread:$0]  %s423_s11, 256, %s686_s5, [#allocation4]  }
 0x1c7   :  { %624 = dma.done.wait [#allocation4], 256  }
 0x1c8   :  { %625 = vsyncadd [#allocation4], 4294967040 }
 0x1c9   :  { %429 = vsyncpa [#allocation3], 1 }
 0x1ca   :  { %430 = vsyncpa [#allocation6], 1 }
 0x1cb   :  { %431 = vsyncpa [#allocation4], 1 }

</bundles_post_ra>
